<compile_context>
chip_gen: v6e
topology: v6e:2x2x1
jax: 0.10.0
libtpu: 0.0.40
codegen_flags: <defaults>
</compile_context>

<pallas_src>
import functools

import jax
import jax.numpy as jnp
from jax.experimental import pallas as pl
from jax.experimental.pallas import tpu as pltpu


def _elr_kernel(alpha, beta, entropic_scale, eps, tile_b,
                # scalar prefetch
                index_ref,                          # SMEM (B,) int32
                # inputs
                logits_ref, labels_ref, target_in,  # VMEM (TB,C) / (TB,1) / (N,C)
                # outputs (both resident across the grid)
                target_out, loss_ref,               # VMEM (N,C) aliased / (B,1)
                # scratch
                rows_buf):                          # VMEM (TB,C) f32
    i = pl.program_id(0)

    # One-time bulk init of the resident output buffer (replaces per-row DMAs).
    @pl.when(i == 0)
    def _():
        target_out[...] = target_in[...]

    # Gather the TB old target rows for this tile with plain VMEM dynamic
    # indexing; row ids come from SMEM scalar prefetch.  No DMAs involved.
    @pl.loop(0, tile_b)
    def _(r):
        row = index_ref[i * tile_b + r]
        rows_buf[pl.ds(r, 1), :] = target_in[pl.ds(row, 1), :]

    logits = logits_ref[...].astype(jnp.float32)     # (TB, C)
    labels = labels_ref[...]                          # (TB, 1) int32
    tb, C = logits.shape

    # ---- y_pred = clamp(softmax(output), eps, 1 - eps) -----------------------
    m = jnp.max(logits, axis=1, keepdims=True)
    z = logits - m
    e = jnp.exp(z)
    s = jnp.sum(e, axis=1, keepdims=True)
    inv_s = pl.reciprocal(s, approx=True)
    inv_s = inv_s * (2.0 - s * inv_s)                 # one Newton step (precision)
    y_pred = jnp.clip(e * inv_s, eps, 1.0 - eps)

    # ---- normalized y_pred (detached in torch; values identical) -------------
    ysum = jnp.sum(y_pred, axis=1, keepdims=True)
    inv_ysum = pl.reciprocal(ysum, approx=True)
    inv_ysum = inv_ysum * (2.0 - ysum * inv_ysum)
    y_norm = y_pred * inv_ysum

    # ---- IsoMax second-part CE, log space (stable); second exp runs on EUP ---
    e_scaled = jnp.exp(entropic_scale * z)            # z <= 0 -> exp <= 1, safe
    lse = entropic_scale * m + jnp.log(jnp.sum(e_scaled, axis=1, keepdims=True))
    onehot = (jax.lax.broadcasted_iota(jnp.int32, (tb, C), 1) == labels
              ).astype(jnp.float32)
    logit_at_label = jnp.sum(logits * onehot, axis=1, keepdims=True)
    ce = lse - entropic_scale * logit_at_label         # (TB, 1)

    # ---- temporal-ensembling update + ELR regularizer ------------------------
    old_rows = rows_buf[...]
    new_rows = beta * old_rows + (1.0 - beta) * y_norm
    elr_reg = jnp.log(1.0 - jnp.sum(new_rows * y_pred, axis=1, keepdims=True))

    off = pl.multiple_of(i * tile_b, tile_b)
    loss_ref[pl.ds(off, tile_b), :] = ce + alpha * elr_reg

    # ---- scatter updated rows into the resident target (VMEM stores, no DMA) -
    rows_buf[...] = new_rows

    @pl.loop(0, tile_b)
    def _(r):
        row = index_ref[i * tile_b + r]
        target_out[pl.ds(row, 1), :] = rows_buf[pl.ds(r, 1), :]


def _choose_tile(B, C, max_tile=1024):
    """Largest batch tile that keeps (TB,C) a few MiB, is (8,·)-legal, divides B."""
    rows_budget = max(8, ((4 << 20) // (4 * max(C, 1))) // 8 * 8)
    max_tile = min(max_tile, rows_budget)
    if B <= max_tile:
        return B
    start = max_tile - (max_tile % 8)
    for tb in range(start, 7, -8):
        if B % tb == 0:
            return tb
    # TODO(synk): ragged batch tiling (pad + masked tail) not implemented.
    return B


def elr_forward(output, label, index, target,
                alpha=3.0, beta=0.7, entropic_scale=10.0, eps=1e-4,
                reduction="mean", max_tile=1024):
    """Functional ELR forward.

    Returns (loss, new_target). `target` is the persistent [num_samples, C]
    buffer (stateful in PyTorch); the updated buffer is returned so the caller
    can carry it.  For a true in-place update, jit the training step and donate
    `target` (the kernel already aliases it to the output buffer).
    """
    B, C = output.shape
    N, C2 = target.shape
    assert C == C2
    assert target.dtype == jnp.float32

    # Resident-in-VMEM plan (fits v5e/v6e 128 MiB and v7x 64 MiB with headroom).
    assert 2 * N * C * 4 <= 24 * (1 << 20), (
        "TODO(synk): target too large for VMEM-resident plan; HBM + batched-DMA "
        "fallback not implemented.")

    TB = _choose_tile(B, C, max_tile)
    assert B % TB == 0
    num_tiles = B // TB

    labels_2d = label.reshape(B, 1).astype(jnp.int32)
    index_i32 = index.astype(jnp.int32)

    kernel = functools.partial(_elr_kernel, float(alpha), float(beta),
                               float(entropic_scale), float(eps), TB)

    grid_spec = pltpu.PrefetchScalarGridSpec(
        num_scalar_prefetch=1,                           # `index` lands in SMEM
        grid=(num_tiles,),
        in_specs=[
            pl.BlockSpec((TB, C), lambda i, idx: (i, 0)),  # logits (streamed)
            pl.BlockSpec((TB, 1), lambda i, idx: (i, 0)),  # labels (streamed)
            pl.BlockSpec((N, C), lambda i, idx: (0, 0)),   # target, resident in VMEM
        ],
        out_specs=(
            pl.BlockSpec((N, C), lambda i, idx: (0, 0)),   # updated target, resident
            pl.BlockSpec((B, 1), lambda i, idx: (0, 0)),   # per-sample loss, resident
        ),
        scratch_shapes=[pltpu.VMEM((TB, C), jnp.float32)],
    )

    # Rough VMEM budget: 2 resident (N,C) buffers + streamed tiles + scratch.
    vmem_need = 4 * (2 * N * C + 5 * TB * C + 2 * B)
    vmem_limit = int(min(max(2 * vmem_need, 32 << 20), 60 << 20))

    new_target, per_sample = pl.pallas_call(
        kernel,
        grid_spec=grid_spec,
        out_shape=(
            jax.ShapeDtypeStruct((N, C), jnp.float32),     # updated buffer
            jax.ShapeDtypeStruct((B, 1), jnp.float32),     # per-sample loss
        ),
        # inputs are (index, logits, labels, target) -> target is input 3
        input_output_aliases={3: 0},
        compiler_params=pltpu.CompilerParams(
            # "arbitrary": the resident target/loss blocks carry across tiles
            # (megacore-parallel sharding would race on them).
            dimension_semantics=("arbitrary",),
            vmem_limit_bytes=vmem_limit),
    )(index_i32, output, labels_2d, target)

    per_sample = per_sample[:, 0]
    if reduction == "none":
        return per_sample, new_target
    return per_sample.mean(), new_target


def _elr_reference(output, label, index, target,
                   alpha=3.0, beta=0.7, entropic_scale=10.0, eps=1e-4):
    """Pure-JAX reference mirroring the PyTorch module (for sanity check)."""
    output = output.astype(jnp.float32)
    y_pred = jax.nn.softmax(output, axis=1)
    y_pred = jnp.clip(y_pred, eps, 1.0 - eps)
    y_norm = y_pred / y_pred.sum(axis=1, keepdims=True)
    rows = beta * target[index] + (1.0 - beta) * y_norm
    new_target = target.at[index].set(rows)
    logp = jax.nn.log_softmax(entropic_scale * output, axis=1)
    ce = -jnp.take_along_axis(logp, label[:, None], axis=1)[:, 0]
    elr_reg = jnp.log(1.0 - (rows * y_pred).sum(axis=1))
    return (ce + alpha * elr_reg).mean(), new_target


if __name__ == "__main__":
    num_samples, num_classes, batch = 64, 10, 16

    key = jax.random.PRNGKey(0)
    k1o, k1l, k1i, k2o, k2l, k2i = jax.random.split(key, 6)

    out1 = jax.random.normal(k1o, (batch, num_classes), dtype=jnp.float32)
    lab1 = jax.random.randint(k1l, (batch,), 0, num_classes, dtype=jnp.int32)
    idx1 = jax.random.permutation(k1i, num_samples)[:batch].astype(jnp.int32)

    out2 = jax.random.normal(k2o, (batch, num_classes), dtype=jnp.float32)
    lab2 = jax.random.randint(k2l, (batch,), 0, num_classes, dtype=jnp.int32)
    idx2 = jax.random.permutation(k2i, num_samples)[:batch].astype(jnp.int32)

    # Persistent buffer, as created in the module __init__.
    target = jnp.zeros((num_samples, num_classes), jnp.float32)

    # Step 1: single grid step (whole batch in one tile).
    loss1, target = elr_forward(out1, lab1, idx1, target)
    # Step 2: force two batch tiles to exercise the resident-target carry path.
    loss2, target = elr_forward(out2, lab2, idx2, target, max_tile=8)
    loss1 = jax.block_until_ready(loss1)
    loss2 = jax.block_until_ready(loss2)
    target = jax.block_until_ready(target)

    # Pure-JAX reference.
    ref_target = jnp.zeros((num_samples, num_classes), jnp.float32)
    ref_loss1, ref_target = _elr_reference(out1, lab1, idx1, ref_target)
    ref_loss2, ref_target = _elr_reference(out2, lab2, idx2, ref_target)

    assert jnp.allclose(loss1, ref_loss1, atol=1e-4, rtol=1e-4), (loss1, ref_loss1)
    assert jnp.allclose(loss2, ref_loss2, atol=1e-4, rtol=1e-4), (loss2, ref_loss2)
    assert jnp.allclose(target, ref_target, atol=1e-5), "target buffer mismatch"

    print("KERNEL_OK")
</pallas_src>

<mosaic_0001>
module attributes {stable_mosaic.version = 11 : i64} {
  func.func @_elr_kernel(%arg0: i32, %arg1: memref<16xi32, #tpu.memory_space<smem>>, %arg2: memref<16x10xf32, #tpu.memory_space<vmem>>, %arg3: memref<16x1xi32, #tpu.memory_space<vmem>>, %arg4: memref<64x10xf32, #tpu.memory_space<vmem>>, %arg5: memref<64x10xf32, #tpu.memory_space<vmem>>, %arg6: memref<16x1xf32, #tpu.memory_space<vmem>>, %arg7: memref<16x10xf32, #tpu.memory_space<vmem>>) attributes {dimension_semantics = [#tpu.dimension_semantics<arbitrary>], iteration_bounds = array<i64: 1>, scalar_prefetch = 1 : i64, scratch_operands = 1 : i64, tpu.core_type = #tpu.core_type<tc>, window_params = [{transform_indices = @transform_0, window_bounds = array<i64: 16, 10>}, {transform_indices = @transform_1, window_bounds = array<i64: 16, 1>}, {pipeline_mode = #tpu.pipeline_mode<synchronous>, transform_indices = @transform_2, window_bounds = array<i64: 64, 10>}, {pipeline_mode = #tpu.pipeline_mode<synchronous>, transform_indices = @transform_3, window_bounds = array<i64: 64, 10>}, {pipeline_mode = #tpu.pipeline_mode<synchronous>, transform_indices = @transform_4, window_bounds = array<i64: 16, 1>}]} {
    %c0_i32 = arith.constant 0 : i32
    %0 = arith.cmpi eq, %arg0, %c0_i32 : i32
    %1 = arith.extui %0 : i1 to i32
    %c0_i32_0 = arith.constant 0 : i32
    %2 = arith.cmpi ne, %1, %c0_i32_0 : i32
    scf.if %2 {
      %c0_32 = arith.constant 0 : index
      %c0_33 = arith.constant 0 : index
      %74 = vector.load %arg4[%c0_32, %c0_33] : memref<64x10xf32, #tpu.memory_space<vmem>>, vector<64x10xf32>
      %c0_34 = arith.constant 0 : index
      %c0_35 = arith.constant 0 : index
      %75 = vector.load %arg5[%c0_34, %c0_35] : memref<64x10xf32, #tpu.memory_space<vmem>>, vector<64x10xf32>
      tpu.vector_store %arg5[%c0_34, %c0_35], %74 {strides = array<i32>} : memref<64x10xf32, #tpu.memory_space<vmem>>, vector<64x10xf32>,
    } else {
    }
    %c0_i32_1 = arith.constant 0 : i32
    %c16_i32 = arith.constant 16 : i32
    %3 = arith.addi %c0_i32_1, %c16_i32 : i32
    %c1_i32 = arith.constant 1 : i32
    scf.for %arg8 = %c0_i32_1 to %3 step %c1_i32  : i32 {
      %c1_i32_32 = arith.constant 1 : i32
      %74 = arith.muli %arg8, %c1_i32_32 : i32
      %c0_i32_33 = arith.constant 0 : i32
      %75 = arith.addi %c0_i32_33, %74 : i32
      %c16_i32_34 = arith.constant 16 : i32
      %76 = arith.muli %arg0, %c16_i32_34 : i32
      %77 = arith.addi %76, %75 : i32
      %78 = arith.index_cast %77 : i32 to index
      %79 = memref.load %arg1[%78] : memref<16xi32, #tpu.memory_space<smem>>
      %80 = arith.index_cast %79 : i32 to index
      %c0_35 = arith.constant 0 : index
      %81 = vector.load %arg4[%80, %c0_35] : memref<64x10xf32, #tpu.memory_space<vmem>>, vector<1x10xf32>
      %82 = arith.index_cast %75 : i32 to index
      %c0_36 = arith.constant 0 : index
      %83 = vector.load %arg7[%82, %c0_36] : memref<16x10xf32, #tpu.memory_space<vmem>>, vector<1x10xf32>
      tpu.vector_store %arg7[%82, %c0_36], %81 {strides = array<i32>} : memref<16x10xf32, #tpu.memory_space<vmem>>, vector<1x10xf32>,
    }
    %c16_i32_2 = arith.constant 16 : i32
    %c0 = arith.constant 0 : index
    %c0_3 = arith.constant 0 : index
    %4 = vector.load %arg2[%c0, %c0_3] : memref<16x10xf32, #tpu.memory_space<vmem>>, vector<16x10xf32>
    %c0_4 = arith.constant 0 : index
    %c0_5 = arith.constant 0 : index
    %5 = vector.load %arg3[%c0_4, %c0_5] : memref<16x1xi32, #tpu.memory_space<vmem>>, vector<16x1xi32>
    %cst = arith.constant dense<0xFF800000> : vector<16xf32>
    %6 = vector.multi_reduction <maximumf>, %4, %cst [1] : vector<16x10xf32> to vector<16xf32>
    %7 = vector.shape_cast %6 : vector<16xf32> to vector<16x1xf32>
    %8 = vector.broadcast %7 : vector<16x1xf32> to vector<16x10xf32>
    %9 = arith.subf %4, %8 : vector<16x10xf32>
    %10 = math.exp %9 : vector<16x10xf32>
    %cst_6 = arith.constant dense<0.000000e+00> : vector<16xf32>
    %11 = vector.multi_reduction <add>, %10, %cst_6 [1] : vector<16x10xf32> to vector<16xf32>
    %12 = vector.shape_cast %11 : vector<16xf32> to vector<16x1xf32>
    %13 = tpu.reciprocal %12 {approx = true} : vector<16x1xf32> -> vector<16x1xf32>
    %14 = arith.mulf %12, %13 : vector<16x1xf32>
    %cst_7 = arith.constant 2.000000e+00 : f32
    %15 = vector.broadcast %cst_7 : f32 to vector<16x1xf32>
    %16 = arith.subf %15, %14 : vector<16x1xf32>
    %17 = arith.mulf %13, %16 : vector<16x1xf32>
    %18 = vector.broadcast %17 : vector<16x1xf32> to vector<16x10xf32>
    %19 = arith.mulf %10, %18 : vector<16x10xf32>
    %cst_8 = arith.constant 9.99999974E-5 : f32
    %cst_9 = arith.constant 0.999899983 : f32
    %20 = vector.broadcast %cst_8 : f32 to vector<16x10xf32>
    %21 = arith.maximumf %20, %19 : vector<16x10xf32>
    %22 = vector.broadcast %cst_9 : f32 to vector<16x10xf32>
    %23 = arith.minimumf %22, %21 : vector<16x10xf32>
    %cst_10 = arith.constant dense<0.000000e+00> : vector<16xf32>
    %24 = vector.multi_reduction <add>, %23, %cst_10 [1] : vector<16x10xf32> to vector<16xf32>
    %25 = vector.shape_cast %24 : vector<16xf32> to vector<16x1xf32>
    %26 = tpu.reciprocal %25 {approx = true} : vector<16x1xf32> -> vector<16x1xf32>
    %27 = arith.mulf %25, %26 : vector<16x1xf32>
    %cst_11 = arith.constant 2.000000e+00 : f32
    %28 = vector.broadcast %cst_11 : f32 to vector<16x1xf32>
    %29 = arith.subf %28, %27 : vector<16x1xf32>
    %30 = arith.mulf %26, %29 : vector<16x1xf32>
    %31 = vector.broadcast %30 : vector<16x1xf32> to vector<16x10xf32>
    %32 = arith.mulf %23, %31 : vector<16x10xf32>
    %cst_12 = arith.constant 1.000000e+01 : f32
    %33 = vector.broadcast %cst_12 : f32 to vector<16x10xf32>
    %34 = arith.mulf %33, %9 : vector<16x10xf32>
    %35 = math.exp %34 : vector<16x10xf32>
    %cst_13 = arith.constant 1.000000e+01 : f32
    %36 = vector.broadcast %cst_13 : f32 to vector<16x1xf32>
    %37 = arith.mulf %36, %7 : vector<16x1xf32>
    %cst_14 = arith.constant dense<0.000000e+00> : vector<16xf32>
    %38 = vector.multi_reduction <add>, %35, %cst_14 [1] : vector<16x10xf32> to vector<16xf32>
    %39 = vector.shape_cast %38 : vector<16xf32> to vector<16x1xf32>
    %40 = math.log %39 : vector<16x1xf32>
    %41 = arith.addf %37, %40 : vector<16x1xf32>
    %42 = tpu.iota {dimensions = array<i32: 1>} : vector<16x10xi32>
    %43 = vector.broadcast %5 : vector<16x1xi32> to vector<16x10xi32>
    %44 = arith.cmpi eq, %42, %43 : vector<16x10xi32>
    %45 = arith.extui %44 : vector<16x10xi1> to vector<16x10xi32>
    %46 = arith.sitofp %45 : vector<16x10xi32> to vector<16x10xf32>
    %47 = arith.mulf %4, %46 : vector<16x10xf32>
    %cst_15 = arith.constant dense<0.000000e+00> : vector<16xf32>
    %48 = vector.multi_reduction <add>, %47, %cst_15 [1] : vector<16x10xf32> to vector<16xf32>
    %49 = vector.shape_cast %48 : vector<16xf32> to vector<16x1xf32>
    %cst_16 = arith.constant 1.000000e+01 : f32
    %50 = vector.broadcast %cst_16 : f32 to vector<16x1xf32>
    %51 = arith.mulf %50, %49 : vector<16x1xf32>
    %52 = arith.subf %41, %51 : vector<16x1xf32>
    %c0_17 = arith.constant 0 : index
    %c0_18 = arith.constant 0 : index
    %53 = vector.load %arg7[%c0_17, %c0_18] : memref<16x10xf32, #tpu.memory_space<vmem>>, vector<16x10xf32>
    %cst_19 = arith.constant 0.699999988 : f32
    %54 = vector.broadcast %cst_19 : f32 to vector<16x10xf32>
    %55 = arith.mulf %54, %53 : vector<16x10xf32>
    %cst_20 = arith.constant 3.000000e-01 : f32
    %56 = vector.broadcast %cst_20 : f32 to vector<16x10xf32>
    %57 = arith.mulf %56, %32 : vector<16x10xf32>
    %58 = arith.addf %55, %57 : vector<16x10xf32>
    %59 = arith.mulf %58, %23 : vector<16x10xf32>
    %cst_21 = arith.constant dense<0.000000e+00> : vector<16xf32>
    %60 = vector.multi_reduction <add>, %59, %cst_21 [1] : vector<16x10xf32> to vector<16xf32>
    %61 = vector.shape_cast %60 : vector<16xf32> to vector<16x1xf32>
    %cst_22 = arith.constant 1.000000e+00 : f32
    %62 = vector.broadcast %cst_22 : f32 to vector<16x1xf32>
    %63 = arith.subf %62, %61 : vector<16x1xf32>
    %64 = math.log %63 : vector<16x1xf32>
    %c16_i32_23 = arith.constant 16 : i32
    %65 = arith.muli %arg0, %c16_i32_23 : i32
    %66 = tpu.assume_multiple %65, 16 : i32
    %cst_24 = arith.constant 3.000000e+00 : f32
    %67 = vector.broadcast %cst_24 : f32 to vector<16x1xf32>
    %68 = arith.mulf %67, %64 : vector<16x1xf32>
    %69 = arith.addf %52, %68 : vector<16x1xf32>
    %70 = arith.index_cast %66 : i32 to index
    %c0_25 = arith.constant 0 : index
    %71 = vector.load %arg6[%70, %c0_25] : memref<16x1xf32, #tpu.memory_space<vmem>>, vector<16x1xf32>
    tpu.vector_store %arg6[%70, %c0_25], %69 {strides = array<i32>} : memref<16x1xf32, #tpu.memory_space<vmem>>, vector<16x1xf32>,
    %c0_26 = arith.constant 0 : index
    %c0_27 = arith.constant 0 : index
    %72 = vector.load %arg7[%c0_26, %c0_27] : memref<16x10xf32, #tpu.memory_space<vmem>>, vector<16x10xf32>
    tpu.vector_store %arg7[%c0_26, %c0_27], %58 {strides = array<i32>} : memref<16x10xf32, #tpu.memory_space<vmem>>, vector<16x10xf32>,
    %c0_i32_28 = arith.constant 0 : i32
    %c16_i32_29 = arith.constant 16 : i32
    %73 = arith.addi %c0_i32_28, %c16_i32_29 : i32
    %c1_i32_30 = arith.constant 1 : i32
    scf.for %arg8 = %c0_i32_28 to %73 step %c1_i32_30  : i32 {
      %c1_i32_32 = arith.constant 1 : i32
      %74 = arith.muli %arg8, %c1_i32_32 : i32
      %c0_i32_33 = arith.constant 0 : i32
      %75 = arith.addi %c0_i32_33, %74 : i32
      %c16_i32_34 = arith.constant 16 : i32
      %76 = arith.muli %arg0, %c16_i32_34 : i32
      %77 = arith.addi %76, %75 : i32
      %78 = arith.index_cast %77 : i32 to index
      %79 = memref.load %arg1[%78] : memref<16xi32, #tpu.memory_space<smem>>
      %80 = arith.index_cast %75 : i32 to index
      %c0_35 = arith.constant 0 : index
      %81 = vector.load %arg7[%80, %c0_35] : memref<16x10xf32, #tpu.memory_space<vmem>>, vector<1x10xf32>
      %82 = arith.index_cast %79 : i32 to index
      %c0_36 = arith.constant 0 : index
      %83 = vector.load %arg5[%82, %c0_36] : memref<64x10xf32, #tpu.memory_space<vmem>>, vector<1x10xf32>
      tpu.vector_store %arg5[%82, %c0_36], %81 {strides = array<i32>} : memref<64x10xf32, #tpu.memory_space<vmem>>, vector<1x10xf32>,
    }
    %c16_i32_31 = arith.constant 16 : i32
    return
  }
  func.func @transform_0(%arg0: i32, %arg1: memref<16xi32, #tpu.memory_space<smem>>) -> (i32, i32) {
    %c0_i32 = arith.constant 0 : i32
    %c0_i32_0 = arith.constant 0 : i32
    return %arg0, %c0_i32 : i32, i32
  }
  func.func @transform_1(%arg0: i32, %arg1: memref<16xi32, #tpu.memory_space<smem>>) -> (i32, i32) {
    %c0_i32 = arith.constant 0 : i32
    %c0_i32_0 = arith.constant 0 : i32
    return %arg0, %c0_i32 : i32, i32
  }
  func.func @transform_2(%arg0: i32, %arg1: memref<16xi32, #tpu.memory_space<smem>>) -> (i32, i32) {
    %c0_i32 = arith.constant 0 : i32
    %c0_i32_0 = arith.constant 0 : i32
    %c0_i32_1 = arith.constant 0 : i32
    return %c0_i32, %c0_i32_0 : i32, i32
  }
  func.func @transform_3(%arg0: i32, %arg1: memref<16xi32, #tpu.memory_space<smem>>) -> (i32, i32) {
    %c0_i32 = arith.constant 0 : i32
    %c0_i32_0 = arith.constant 0 : i32
    %c0_i32_1 = arith.constant 0 : i32
    return %c0_i32, %c0_i32_0 : i32, i32
  }
  func.func @transform_4(%arg0: i32, %arg1: memref<16xi32, #tpu.memory_space<smem>>) -> (i32, i32) {
    %c0_i32 = arith.constant 0 : i32
    %c0_i32_0 = arith.constant 0 : i32
    %c0_i32_1 = arith.constant 0 : i32
    return %c0_i32, %c0_i32_0 : i32, i32
  }
}

</mosaic_0001>

<bundles_post_ra>
// kernel: tpu_custom_call.1
= control target key start
LH: loop header
LB: loop body
LE: loop exit
PB: predicated region body
PF: predicated region fallthrough
CT: control target
= control target key end

     0   :  { %s452_s0 = inlined_call_operand.vmem [shape: s32[16], index: 0, kind: input, shape index: {}]   ;;  %s453_s1 = inlined_call_operand.vmem [shape: f32[16,10], index: 1, kind: input, shape index: {}]   ;;  %s454_s2 = inlined_call_operand.vmem [shape: s32[16,1], index: 2, kind: input, shape index: {}]   ;;  %s455_s3 = inlined_call_operand.vmem [shape: f32[64,10], index: 3, kind: input, shape index: {}, may-alias: {3,4}]   ;;  %s456_s4 = inlined_call_operand.vmem [shape: f32[64,10], index: 4, kind: output, shape index: {0}, may-alias: {3,4}]   ;;  %s457_s5 = inlined_call_operand.vmem [shape: f32[16,1], index: 5, kind: output, shape index: {1}]  }
   0x1   :  { %s11_s20 = sshll.u32 %s452_s0, 4  ;;  %s12_s20 = int_to_ptr.vmem [resolvable:$true] %s11_s20 }
   0x2   :  { %s272_s21 = scalar_lea.vmem %s12_s20, 16  ;;  %p277_p1 = scmp.lt.s32.totalorder %s12_s20, %s12_s20 }
   0x3   :  { %p273_p0 = scmp.ne.s32.totalorder %s12_s20, %s272_s21  ;;  %p278_p2 = scmp.lt.s32.totalorder %s272_s21, %s272_s21 }
   0x5   :  { %p279_p3 = por %p278_p2, %p277_p1 }
   0x7   :  { %p280_p4 = pnand %p279_p3, %p273_p0 }
   0x9   :  { %283 = shalt.err (!%p280_p4)  }
   0xa   :  { %s302_s22 = smov [#allocation4]  }
   0xb   :  { %14 = dma.vmem_to_smem %s12_s20, 16, %s302_s22, [#allocation3] }
   0xc   :  { %292 = dma.done.wait [#allocation3], 16 }
   0xd   :  { %293 = vsyncadd [#allocation3], 4294967280 }
   0xe   :  { %16 = sfence }
   0xf   :  { %v27_v0 = vld [vmem:[%s455_s3] sm:$0xff]  ;;  %vm35_vm0 = vcmask 80896   ;;  %v28_v1 = vld [vmem:[%s455_s3 + $0x8] sm:$0xff]  ;;  %v29_v2 = vld [vmem:[%s455_s3 + $0x10] sm:$0xff]  ;;  %s294_s28 = smov 0  }
  0x10   :  { %36 = vst.msk [vmem:[%s456_s4] sm:$0xff] %vm35_vm0, %v27_v0  ;;  %37 = vst.msk [vmem:[%s456_s4 + $0x8] sm:$0xff] %vm35_vm0, %v28_v1 }
  0x11   :  { %38 = vst.msk [vmem:[%s456_s4 + $0x10] sm:$0xff] %vm35_vm0, %v29_v2 }
  0x18   :  { %v30_v3 = vld [vmem:[%s455_s3 + $0x18] sm:$0xff]  ;;  %v31_v4 = vld [vmem:[%s455_s3 + $0x20] sm:$0xff]  ;;  %v32_v5 = vld [vmem:[%s455_s3 + $0x28] sm:$0xff] }
  0x19   :  { %39 = vst.msk [vmem:[%s456_s4 + $0x18] sm:$0xff] %vm35_vm0, %v30_v3  ;;  %40 = vst.msk [vmem:[%s456_s4 + $0x20] sm:$0xff] %vm35_vm0, %v31_v4 }
  0x1a   :  { %41 = vst.msk [vmem:[%s456_s4 + $0x28] sm:$0xff] %vm35_vm0, %v32_v5 }
  0x21   :  { %v33_v6 = vld [vmem:[%s455_s3 + $0x30] sm:$0xff]  ;;  %v34_v7 = vld [vmem:[%s455_s3 + $0x38] sm:$0xff] }
  0x22   :  { %42 = vst.msk [vmem:[%s456_s4 + $0x30] sm:$0xff] %vm35_vm0, %v33_v6  ;;  %43 = vst.msk [vmem:[%s456_s4 + $0x38] sm:$0xff] %vm35_vm0, %v34_v7 }
  0x23 LB: > { %s52_s29 = sld [smem:[#allocation4 + %s296_s28]]  ;;  %vm56_vm1 = vcmask 73728   ;;  %s55_s8 = scalar_lea.vmem [#allocation2], %s296_s28  ;;  %s296_s28 = sphi %s294_s28, %s49_s28  }
  0x24   : > { %s49_s28 = sadd.s32 1, %s296_s28  }
  0x25   : > { %p46_p5 = scmp.ge.s32.totalorder %s49_s28, 16  }
  0x26   :  { %v401_v9 = vld [vmem:[%s453_s1] sm:$0xff] (%p46_p5)  ;;  %v406_v10 = vld [vmem:[%s453_s1 + $0x8] sm:$0xff] (%p46_p5)  ;;  %v303_v23 = vmov (%p46_p5), 0   ;;  %v131_v57 = vlaneseq (%p46_p5)  ;;  %vm185_vm4 = vcmask (%p46_p5), 7168   ;;  %s298_s18 = smov (%p46_p5), 0  }
  0x27   :  { %48 = sbr.rel (!%p46_p5) target bundleno = 35 (0x23), region = 63  ;;  %v63_v11 = vsel (%p46_p5), %vm35_vm0, %v401_v9, -inf  ;;  %v66_v12 = vsel (%p46_p5), %vm35_vm0, %v406_v10, -inf  ;;  %247 = vset.pattern.permute.xlu1 (%p46_p5), %v303_v23  ;;  %246 = vset.pattern.permute.xlu0 (%p46_p5), %v303_v23  ;;  %v61_v42 = vld [vmem:[%s454_s2 + $0x8] sm:$0xff] (%p46_p5)  ;;  %v60_v43 = vld [vmem:[%s454_s2] sm:$0xff] (%p46_p5) }
  0x28   :  { %64 = vmax.xlane.f32.xlu0 (%p46_p5), %v63_v11  ;;  %v132_v1 = vand.u32 (%p46_p5), 127, %v131_v57 }
  0x29   : > { %s53_s7 = scalar_lea.vmem %s455_s3, %s52_s29 }
  0x2a   : > { %v54_v8 = vld [vmem:[%s53_s7] sm:$0x1] }
  0x2b   : > { %57 = vst.msk [vmem:[%s55_s8] sm:$0x1] %vm56_vm1, %v54_v8 }
  0x2c   :  { %67 = vmax.xlane.f32.xlu0 %v66_v12 }
  0x32   :  { %v157_v59 = vld [vmem:[#allocation2] sm:$0xff]  ;;  %v158_v2 = vld [vmem:[#allocation2 + $0x8] sm:$0xff] }
  0x33   :  { %v159_v0 = vmul.f32 0.7, %v157_v59  ;;  %v160_v6 = vmul.f32 0.7, %v158_v2 }
  0xb1   :  { %v412_v13 = vpop.xlane.xlu0 %64 }
  0xb2   :  { %v69_v14 = vsub.f32 %v401_v9, %v412_v13 }
  0xb4   :  { %v71_v15 = vmul.f32 1.442695, %v69_v14  ;;  %v111_v45 = vmul.f32 10.0, %v69_v14 }
  0xb5   :  { %v416_v16 = vpop.xlane.xlu0 %67 }
  0xb6   :  { %248 = vpow2.f32 %v71_v15  ;;  %v70_v17 = vsub.f32 %v406_v10, %v416_v16  ;;  %v113_v47 = vmul.f32 1.442695, %v111_v45  ;;  %v304_v15 = vmov 0.0  }
  0xb8   :  { %v73_v18 = vmul.f32 1.442695, %v70_v17  ;;  %v112_v44 = vmul.f32 10.0, %v70_v17 }
  0xba   :  { %250 = vpow2.f32 %v73_v18  ;;  %v115_v46 = vmul.f32 1.442695, %v112_v44 }
  0xc3   :  { %v249_v19 = vpop.eup %248 }
  0xc4   :  { %v75_v20 = vsel %vm35_vm0, %v249_v19, 0.0 }
  0xc5   :  { %76 = vadd.xlane.f32.xlu1 %v75_v20 }
  0xc7   :  { %v251_v21 = vpop.eup %250 }
  0xc8   :  { %v78_v22 = vsel %vm35_vm0, %v251_v21, 0.0 }
  0xc9   :  { %79 = vadd.xlane.f32.xlu1 %v78_v22 }
 0x14e   :  { %v77_v24 = vpop.xlane.xlu1 %76 }
 0x14f   :  { %252 = vrcp.f32 %v77_v24 }
 0x152   :  { %v80_v25 = vpop.xlane.xlu1 %79 }
 0x153   :  { %254 = vrcp.f32 %v80_v25 }
 0x154   :  { %256 = vpow2.f32 %v115_v46 }
 0x155   :  { %258 = vpow2.f32 %v113_v47 }
 0x15c   :  { %v253_v26 = vpop.eup %252 }
 0x15d   :  { %v83_v27 = vmul.f32 %v253_v26, %v77_v24 }
 0x15f   :  { %v85_v28 = vsub.f32 2.0, %v83_v27 }
 0x160   :  { %v255_v29 = vpop.eup %254 }
 0x161   :  { %v87_v30 = vmul.f32 %v253_v26, %v85_v28  ;;  %v84_v31 = vmul.f32 %v255_v29, %v80_v25  ;;  %v257_v48 = vpop.eup %256 }
 0x162   :  { %v122_v49 = vsel %vm35_vm0, %v257_v48, 0.0  ;;  %v259_v50 = vpop.eup %258 }
 0x163   :  { %v86_v32 = vsub.f32 2.0, %v84_v31  ;;  %v89_v33 = vmul.f32 %v249_v19, %v87_v30  ;;  %v119_v51 = vsel %vm35_vm0, %v259_v50, 0.0 }
 0x165   :  { %v88_v34 = vmul.f32 %v255_v29, %v86_v32  ;;  %v91_v35 = vmax.f32 %v89_v33, 0.0001 }
 0x167   :  { %v93_v36 = vmin.f32 %v91_v35, 0.9999  ;;  %v90_v37 = vmul.f32 %v251_v21, %v88_v34 }
 0x169   :  { %v95_v38 = vsel %vm35_vm0, %v93_v36, 0.0  ;;  %v92_v39 = vmax.f32 %v90_v37, 0.0001 }
 0x16a   :  { %96 = vadd.xlane.f32.xlu0 %v95_v38 }
 0x16b   :  { %v94_v40 = vmin.f32 %v92_v39, 0.9999 }
 0x16d   :  { %v98_v41 = vsel %vm35_vm0, %v94_v40, 0.0 }
 0x16e   :  { %99 = vadd.xlane.f32.xlu1 %v98_v41 }
 0x17f   :  { %137 = vperm.xlu1 %247, %v61_v42   ;;  %v118_v42 = vmul.f32 10.0, %v416_v16 }
 0x180   :  { %134 = vperm.xlu0 %246, %v60_v43  }
 0x19f   :  { %123 = vadd.xlane.f32.xlu0 %v122_v49 }
 0x1a3   :  { %120 = vadd.xlane.f32.xlu1 %v119_v51 }
 0x1f3   :  { %v97_v52 = vpop.xlane.xlu0 %96 }
 0x1f4   :  { %260 = vrcp.f32 %v97_v52 }
 0x1f7   :  { %v100_v53 = vpop.xlane.xlu1 %99 }
 0x1f8   :  { %262 = vrcp.f32 %v100_v53 }
 0x1fb   :  { %v135_v3 = vpop.permute.xlu0 %134  ;;  %v138_v11 = vpop.permute.xlu1 %137 }
 0x1fc   :  { %vm139_vm2 = vcmp.eq.s32.totalorder %v132_v1, %v135_v3  ;;  %vm140_vm3 = vcmp.eq.s32.totalorder %v132_v1, %v138_v11 }
 0x1fd   :  { %v225_v17 = vsel %vm139_vm2, 1.0, %v304_v15  ;;  %v226_v22 = vsel %vm140_vm3, 1.0, %v304_v15 }
 0x1fe   :  { %v145_v21 = vmul.f32 %v225_v17, %v401_v9  ;;  %v146_v25 = vmul.f32 %v226_v22, %v406_v10  ;;  %v117_v10 = vmul.f32 10.0, %v412_v13 }
 0x200   :  { %v147_v24 = vsel %vm35_vm0, %v145_v21, 0.0  ;;  %v150_v26 = vsel %vm35_vm0, %v146_v25, 0.0 }
 0x201   :  { %v261_v54 = vpop.eup %260 }
 0x202   :  { %v103_v55 = vmul.f32 %v261_v54, %v97_v52 }
 0x204   :  { %v105_v56 = vsub.f32 2.0, %v103_v55 }
 0x205   :  { %v263_v58 = vpop.eup %262 }
 0x206   :  { %v107_v60 = vmul.f32 %v261_v54, %v105_v56  ;;  %v104_v61 = vmul.f32 %v263_v58, %v100_v53 }
 0x208   :  { %v106_v62 = vsub.f32 2.0, %v104_v61  ;;  %v109_v63 = vmul.f32 %v107_v60, %v93_v36 }
 0x20a   :  { %v108_v4 = vmul.f32 %v263_v58, %v106_v62  ;;  %v161_v5 = vmul.f32 0.3, %v109_v63 }
 0x20c   :  { %v163_v7 = vadd.f32 %v161_v5, %v159_v0  ;;  %v110_v8 = vmul.f32 %v108_v4, %v94_v40 }
 0x20e   :  { %v165_v12 = vmul.f32 %v163_v7, %v93_v36  ;;  %188 = vst.msk [vmem:[#allocation2] sm:$0xff] %vm35_vm0, %v163_v7  ;;  %v162_v14 = vmul.f32 0.3, %v110_v8 }
 0x210   :  { %v167_v18 = vsel %vm35_vm0, %v165_v12, 0.0  ;;  %v164_v19 = vadd.f32 %v162_v14, %v160_v6 }
 0x211   :  { %168 = vadd.xlane.f32.xlu1 %v167_v18 }
 0x212   :  { %v166_v20 = vmul.f32 %v164_v19, %v94_v40  ;;  %189 = vst.msk [vmem:[#allocation2 + $0x8] sm:$0xff] %vm35_vm0, %v164_v19 }
 0x214   :  { %v170_v23 = vsel %vm35_vm0, %v166_v20, 0.0 }
 0x215   :  { %171 = vadd.xlane.f32.xlu1 %v170_v23 }
 0x219   :  { %148 = vadd.xlane.f32.xlu1 %v147_v24 }
 0x21d   :  { %151 = vadd.xlane.f32.xlu1 %v150_v26 }
 0x228   :  { %v124_v28 = vpop.xlane.xlu0 %123 }
 0x22c   :  { %v121_v27 = vpop.xlane.xlu1 %120 }
 0x22d   :  { %264 = vlog2.f32 %v121_v27 }
 0x22e   :  { %266 = vlog2.f32 %v124_v28 }
 0x23a   :  { %v265_v32 = vpop.eup %264 }
 0x23b   :  { %v126_v34 = vmul.f32 0.6931472, %v265_v32  ;;  %v267_v35 = vpop.eup %266 }
 0x23c   :  { %v128_v39 = vmul.f32 0.6931472, %v267_v35 }
 0x23d   :  { %v129_v41 = vadd.f32 %v126_v34, %v117_v10 }
 0x23e   :  { %v130_v49 = vadd.f32 %v128_v39, %v118_v42 }
 0x29a   :  { %v169_v29 = vpop.xlane.xlu1 %168 }
 0x29b   :  { %v173_v30 = vsub.f32 1.0, %v169_v29 }
 0x29d   :  { %268 = vlog2.f32 %v173_v30 }
 0x29e   :  { %v172_v9 = vpop.xlane.xlu1 %171 }
 0x29f   :  { %v174_v31 = vsub.f32 1.0, %v172_v9 }
 0x2a1   :  { %270 = vlog2.f32 %v174_v31 }
 0x2a2   :  { %v149_v33 = vpop.xlane.xlu1 %148 }
 0x2a3   :  { %v153_v36 = vmul.f32 10.0, %v149_v33 }
 0x2a5   :  { %v155_v44 = vsub.f32 %v129_v41, %v153_v36 }
 0x2a6   :  { %v152_v38 = vpop.xlane.xlu1 %151 }
 0x2a7   :  { %v154_v45 = vmul.f32 10.0, %v152_v38 }
 0x2a9   :  { %v156_v13 = vsub.f32 %v130_v49, %v154_v45 }
 0x2aa   :  { %v269_v37 = vpop.eup %268 }
 0x2ab   :  { %v176_v40 = vmul.f32 0.6931472, %v269_v37 }
 0x2ad   :  { %v180_v43 = vmul.f32 3.0, %v176_v40 }
 0x2ae   :  { %v271_v46 = vpop.eup %270 }
 0x2af   :  { %v178_v47 = vmul.f32 0.6931472, %v271_v46  ;;  %v182_v48 = vadd.f32 %v180_v43, %v155_v44 }
 0x2b1   :  { %v181_v50 = vmul.f32 3.0, %v178_v47  ;;  %186 = vst.msk [vmem:[%s457_s5] sm:$0xff] %vm185_vm4, %v182_v48 }
 0x2b3   :  { %v183_v51 = vadd.f32 %v181_v50, %v156_v13 }
 0x2b5   :  { %187 = vst.msk [vmem:[%s457_s5 + $0x8] sm:$0xff] %vm185_vm4, %v183_v51 }
 0x2b6 LB: > { %s197_s19 = sld [smem:[#allocation4 + %s300_s18]]  ;;  %s198_s20 = scalar_lea.vmem [#allocation2], %s300_s18  ;;  %s300_s18 = sphi %s298_s18, %s195_s18  }
 0x2b7   : > { %v199_v16 = vld [vmem:[%s198_s20] sm:$0x1]  ;;  %s195_s18 = sadd.s32 1, %s300_s18  }
 0x2b8   : > { %p192_p6 = scmp.ge.s32.totalorder %s195_s18, 16  }
 0x2ba   :  { %194 = sbr.rel (!%p192_p6) target bundleno = 694 (0x2b6), region = 74 }
 0x2bc   : > { %s200_s23 = scalar_lea.vmem %s456_s4, %s197_s19 }
 0x2bd   : > { %202 = vst.msk [vmem:[%s200_s23] sm:$0x1] %vm56_vm1, %v199_v16 }

</bundles_post_ra>
